<compile_context>
chip_gen: v5e
topology: v5e:2x2
jax: 0.10.0
libtpu: 0.0.40
codegen_flags: <defaults>
</compile_context>

<pallas_src>
import functools

import jax
import jax.numpy as jnp
from jax import lax
from jax.experimental import pallas as pl
from jax.experimental.pallas import tpu as pltpu


def basic_block_kernel(x_ref, w1_ref, w2_ref, bias_ref, mask_ref, o_ref, *,
                       img_w):
    # x_ref    : (C, N*H*W)  activations, rows = channels, cols = (n, y, x)
    # w1_ref   : (C, 9*C)    conv1 weight slab (BN1 scale folded in)
    # w2_ref   : (C, 9*C)    conv2 weight slab (BN2 scale folded in)
    # bias_ref : (C, 2)      folded BN biases [bias1, bias2] per channel
    # mask_ref : (9, N*H*W)  1.0 where the shifted tap is in-bounds, else 0.0
    # o_ref    : (C, N*H*W)
    nhw = x_ref.shape[1]

    def im2col(a):
        # (9*C, N*H*W) patch matrix via XLU rolls + boundary masks.
        pieces = []
        for dy in (-1, 0, 1):
            for dx in (-1, 0, 1):
                tap = (dy + 1) * 3 + (dx + 1)
                s = dy * img_w + dx          # flat-index shift of this tap
                if dy == 0 and dx == 0:
                    pieces.append(a)         # center tap: no shift, no mask
                else:
                    shifted = pltpu.roll(a, shift=(-s) % nhw, axis=1)
                    pieces.append(shifted * mask_ref[tap:tap + 1, :])
        return jnp.concatenate(pieces, axis=0)

    x = x_ref[...]

    # conv1 + bn1 (folded) -> relu   : one MXU matmul, K = 9*Cin
    h = jnp.dot(w1_ref[...], im2col(x), preferred_element_type=jnp.float32)
    h = jnp.maximum(h + bias_ref[:, 0:1], 0.0)

    # conv2 + bn2 (folded) -> +residual -> relu
    y = jnp.dot(w2_ref[...], im2col(h), preferred_element_type=jnp.float32)
    y = y + bias_ref[:, 1:2]

    # identity residual (valid: Cin == C, stride == 1, downsample is None)
    o_ref[...] = jnp.maximum(y + x, 0.0)


@functools.partial(jax.jit, static_argnames=("eps",))
def basic_block_forward(x_nchw, w1, g1, b1, m1, v1, w2, g2, b2, m2, v2,
                        eps=1e-5):
    """BasicBlock forward. x_nchw: (N, C, H, W) like PyTorch. Returns NCHW."""
    N, C, H, W = x_nchw.shape
    NHW = N * H * W

    # (N, C, H, W) -> (C, N*H*W); lane-dense layout for the kernel.
    x_flat = jnp.transpose(x_nchw, (1, 0, 2, 3)).reshape(C, NHW)
    x_flat = x_flat.astype(jnp.float32)

    # fold BN (eval mode): scale into the conv weights, shift into a bias
    inv1 = g1 / jnp.sqrt(v1 + eps)
    inv2 = g2 / jnp.sqrt(v2 + eps)
    bias = jnp.stack([b1 - m1 * inv1, b2 - m2 * inv2], axis=1)
    bias = bias.astype(jnp.float32)                             # (C, 2)

    # torch OIHW -> (C_out, ky, kx, C_in) -> (C_out, 9*C_in) slab, BN-scaled
    w1_mat = (jnp.transpose(w1, (0, 2, 3, 1)) *
              inv1[:, None, None, None]).reshape(C, 9 * C).astype(jnp.float32)
    w2_mat = (jnp.transpose(w2, (0, 2, 3, 1)) *
              inv2[:, None, None, None]).reshape(C, 9 * C).astype(jnp.float32)

    # per-tap validity masks over the flat (n, y, x) index (constant under jit)
    ii = jnp.arange(NHW, dtype=jnp.int32)
    yy = (ii // W) % H
    xx = ii % W
    rows = []
    for dy in (-1, 0, 1):
        for dx in (-1, 0, 1):
            valid = ((yy + dy >= 0) & (yy + dy < H) &
                     (xx + dx >= 0) & (xx + dx < W))
            rows.append(valid.astype(jnp.float32))
    mask = jnp.stack(rows, axis=0)  # (9, NHW)

    kernel = functools.partial(basic_block_kernel, img_w=W)

    out_flat = pl.pallas_call(
        kernel,
        out_shape=jax.ShapeDtypeStruct((C, NHW), jnp.float32),
        grid=(1,),   # batch folded into the lane dimension: one step
        in_specs=[
            pl.BlockSpec((C, NHW), lambda i: (0, 0)),
            pl.BlockSpec((C, 9 * C), lambda i: (0, 0)),
            pl.BlockSpec((C, 9 * C), lambda i: (0, 0)),
            pl.BlockSpec((C, 2), lambda i: (0, 0)),
            pl.BlockSpec((9, NHW), lambda i: (0, 0)),
        ],
        out_specs=pl.BlockSpec((C, NHW), lambda i: (0, 0)),
        compiler_params=pltpu.CompilerParams(
            dimension_semantics=("arbitrary",)),
    )(x_flat, w1_mat, w2_mat, bias, mask)

    return jnp.transpose(out_flat.reshape(C, N, H, W), (1, 0, 2, 3))


def _reference_forward(x_nchw, w1, g1, b1, m1, v1, w2, g2, b2, m2, v2,
                       eps=1e-5):
    """Pure-JAX reference (same eval-mode BN semantics as torch .eval())."""
    x = jnp.transpose(x_nchw, (0, 2, 3, 1)).astype(jnp.float32)
    w1h = jnp.transpose(w1, (2, 3, 1, 0)).astype(jnp.float32)
    w2h = jnp.transpose(w2, (2, 3, 1, 0)).astype(jnp.float32)
    dn = ('NHWC', 'HWIO', 'NHWC')

    out = lax.conv_general_dilated(x, w1h, (1, 1), 'SAME', dimension_numbers=dn)
    out = (out - m1) / jnp.sqrt(v1 + eps) * g1 + b1
    out = jnp.maximum(out, 0.0)
    out = lax.conv_general_dilated(out, w2h, (1, 1), 'SAME', dimension_numbers=dn)
    out = (out - m2) / jnp.sqrt(v2 + eps) * g2 + b2
    out = jnp.maximum(out + x, 0.0)
    return jnp.transpose(out, (0, 3, 1, 2))


if __name__ == "__main__":
    # BasicBlock(inplanes=4, planes=4, stride=1, downsample=None)
    N, C, H, W = 2, 4, 16, 16

    key = jax.random.PRNGKey(0)
    ks = jax.random.split(key, 10)

    x = jax.random.normal(ks[0], (N, C, H, W), dtype=jnp.float32)

    # conv weights (torch OIHW), no bias
    w1 = jax.random.normal(ks[1], (C, C, 3, 3), dtype=jnp.float32) * 0.1
    w2 = jax.random.normal(ks[2], (C, C, 3, 3), dtype=jnp.float32) * 0.1

    # BN1 / BN2 parameters and running statistics (deterministic, non-trivial)
    g1 = 1.0 + 0.1 * jax.random.normal(ks[3], (C,), dtype=jnp.float32)
    b1 = 0.1 * jax.random.normal(ks[4], (C,), dtype=jnp.float32)
    m1 = 0.1 * jax.random.normal(ks[5], (C,), dtype=jnp.float32)
    v1 = 1.0 + 0.1 * jax.random.uniform(ks[6], (C,), dtype=jnp.float32)

    g2 = 1.0 + 0.1 * jax.random.normal(ks[7], (C,), dtype=jnp.float32)
    b2 = 0.1 * jax.random.normal(ks[8], (C,), dtype=jnp.float32)
    m2 = 0.1 * jax.random.normal(ks[9], (C,), dtype=jnp.float32)
    v2 = 1.0 + 0.1 * jax.random.uniform(jax.random.PRNGKey(1), (C,),
                                        dtype=jnp.float32)

    out = basic_block_forward(x, w1, g1, b1, m1, v1, w2, g2, b2, m2, v2)
    out = jax.block_until_ready(out)

    ref = _reference_forward(x, w1, g1, b1, m1, v1, w2, g2, b2, m2, v2)
    ref = jax.block_until_ready(ref)

    assert out.shape == (N, C, H, W), out.shape
    assert jnp.allclose(out, ref, rtol=1e-4, atol=1e-4), \
        f"max abs err = {jnp.max(jnp.abs(out - ref))}"

    print("KERNEL_OK")
</pallas_src>

<mosaic_0001>
module attributes {stable_mosaic.version = 11 : i64} {
  func.func @basic_block_kernel(%arg0: i32, %arg1: memref<4x512xf32, #tpu.memory_space<vmem>>, %arg2: memref<4x36xf32, #tpu.memory_space<vmem>>, %arg3: memref<4x36xf32, #tpu.memory_space<vmem>>, %arg4: memref<4x2xf32, #tpu.memory_space<vmem>>, %arg5: memref<9x512xf32, #tpu.memory_space<vmem>>, %arg6: memref<4x512xf32, #tpu.memory_space<vmem>>) attributes {dimension_semantics = [#tpu.dimension_semantics<arbitrary>], iteration_bounds = array<i64: 1>, scalar_prefetch = 0 : i64, scratch_operands = 0 : i64, tpu.core_type = #tpu.core_type<tc>, window_params = [{pipeline_mode = #tpu.pipeline_mode<synchronous>, transform_indices = @transform_0, window_bounds = array<i64: 4, 512>}, {pipeline_mode = #tpu.pipeline_mode<synchronous>, transform_indices = @transform_1, window_bounds = array<i64: 4, 36>}, {pipeline_mode = #tpu.pipeline_mode<synchronous>, transform_indices = @transform_2, window_bounds = array<i64: 4, 36>}, {pipeline_mode = #tpu.pipeline_mode<synchronous>, transform_indices = @transform_3, window_bounds = array<i64: 4, 2>}, {pipeline_mode = #tpu.pipeline_mode<synchronous>, transform_indices = @transform_4, window_bounds = array<i64: 9, 512>}, {pipeline_mode = #tpu.pipeline_mode<synchronous>, transform_indices = @transform_5, window_bounds = array<i64: 4, 512>}]} {
    %c0 = arith.constant 0 : index
    %c0_0 = arith.constant 0 : index
    %0 = vector.load %arg1[%c0, %c0_0] : memref<4x512xf32, #tpu.memory_space<vmem>>, vector<4x512xf32>
    %c0_1 = arith.constant 0 : index
    %c0_2 = arith.constant 0 : index
    %1 = vector.load %arg2[%c0_1, %c0_2] : memref<4x36xf32, #tpu.memory_space<vmem>>, vector<4x36xf32>
    %c17_i32 = arith.constant 17 : i32
    %2 = tpu.dynamic_rotate %0 by %c17_i32 dim 1 : vector<4x512xf32>, i32 -> vector<4x512xf32>
    %c0_3 = arith.constant 0 : index
    %c0_4 = arith.constant 0 : index
    %3 = vector.load %arg5[%c0_3, %c0_4] : memref<9x512xf32, #tpu.memory_space<vmem>>, vector<1x512xf32>
    %4 = vector.broadcast %3 : vector<1x512xf32> to vector<4x512xf32>
    %5 = arith.mulf %2, %4 : vector<4x512xf32>
    %c16_i32 = arith.constant 16 : i32
    %6 = tpu.dynamic_rotate %0 by %c16_i32 dim 1 : vector<4x512xf32>, i32 -> vector<4x512xf32>
    %c1 = arith.constant 1 : index
    %c0_5 = arith.constant 0 : index
    %7 = vector.load %arg5[%c1, %c0_5] : memref<9x512xf32, #tpu.memory_space<vmem>>, vector<1x512xf32>
    %8 = vector.broadcast %7 : vector<1x512xf32> to vector<4x512xf32>
    %9 = arith.mulf %6, %8 : vector<4x512xf32>
    %c15_i32 = arith.constant 15 : i32
    %10 = tpu.dynamic_rotate %0 by %c15_i32 dim 1 : vector<4x512xf32>, i32 -> vector<4x512xf32>
    %c2 = arith.constant 2 : index
    %c0_6 = arith.constant 0 : index
    %11 = vector.load %arg5[%c2, %c0_6] : memref<9x512xf32, #tpu.memory_space<vmem>>, vector<1x512xf32>
    %12 = vector.broadcast %11 : vector<1x512xf32> to vector<4x512xf32>
    %13 = arith.mulf %10, %12 : vector<4x512xf32>
    %c1_i32 = arith.constant 1 : i32
    %14 = tpu.dynamic_rotate %0 by %c1_i32 dim 1 : vector<4x512xf32>, i32 -> vector<4x512xf32>
    %c3 = arith.constant 3 : index
    %c0_7 = arith.constant 0 : index
    %15 = vector.load %arg5[%c3, %c0_7] : memref<9x512xf32, #tpu.memory_space<vmem>>, vector<1x512xf32>
    %16 = vector.broadcast %15 : vector<1x512xf32> to vector<4x512xf32>
    %17 = arith.mulf %14, %16 : vector<4x512xf32>
    %c511_i32 = arith.constant 511 : i32
    %18 = tpu.dynamic_rotate %0 by %c511_i32 dim 1 : vector<4x512xf32>, i32 -> vector<4x512xf32>
    %c5 = arith.constant 5 : index
    %c0_8 = arith.constant 0 : index
    %19 = vector.load %arg5[%c5, %c0_8] : memref<9x512xf32, #tpu.memory_space<vmem>>, vector<1x512xf32>
    %20 = vector.broadcast %19 : vector<1x512xf32> to vector<4x512xf32>
    %21 = arith.mulf %18, %20 : vector<4x512xf32>
    %c497_i32 = arith.constant 497 : i32
    %22 = tpu.dynamic_rotate %0 by %c497_i32 dim 1 : vector<4x512xf32>, i32 -> vector<4x512xf32>
    %c6 = arith.constant 6 : index
    %c0_9 = arith.constant 0 : index
    %23 = vector.load %arg5[%c6, %c0_9] : memref<9x512xf32, #tpu.memory_space<vmem>>, vector<1x512xf32>
    %24 = vector.broadcast %23 : vector<1x512xf32> to vector<4x512xf32>
    %25 = arith.mulf %22, %24 : vector<4x512xf32>
    %c496_i32 = arith.constant 496 : i32
    %26 = tpu.dynamic_rotate %0 by %c496_i32 dim 1 : vector<4x512xf32>, i32 -> vector<4x512xf32>
    %c7 = arith.constant 7 : index
    %c0_10 = arith.constant 0 : index
    %27 = vector.load %arg5[%c7, %c0_10] : memref<9x512xf32, #tpu.memory_space<vmem>>, vector<1x512xf32>
    %28 = vector.broadcast %27 : vector<1x512xf32> to vector<4x512xf32>
    %29 = arith.mulf %26, %28 : vector<4x512xf32>
    %c495_i32 = arith.constant 495 : i32
    %30 = tpu.dynamic_rotate %0 by %c495_i32 dim 1 : vector<4x512xf32>, i32 -> vector<4x512xf32>
    %c8 = arith.constant 8 : index
    %c0_11 = arith.constant 0 : index
    %31 = vector.load %arg5[%c8, %c0_11] : memref<9x512xf32, #tpu.memory_space<vmem>>, vector<1x512xf32>
    %32 = vector.broadcast %31 : vector<1x512xf32> to vector<4x512xf32>
    %33 = arith.mulf %30, %32 : vector<4x512xf32>
    %34 = tpu.concatenate %5, %9, %13, %17, %0, %21, %25, %29, %33 in 0 : vector<4x512xf32>, vector<4x512xf32>, vector<4x512xf32>, vector<4x512xf32>, vector<4x512xf32>, vector<4x512xf32>, vector<4x512xf32>, vector<4x512xf32>, vector<4x512xf32> -> vector<36x512xf32>
    %cst = arith.constant dense<0.000000e+00> : vector<4x512xf32>
    %35 = tpu.matmul %1, %34, %cst {dimension_numbers = #tpu.dot_dimension_numbers<[1], [0], [0], [1], [0, 0, 1, 1], [], []>} : vector<4x36xf32>, vector<36x512xf32>, vector<4x512xf32> -> vector<4x512xf32>
    %c0_12 = arith.constant 0 : index
    %c0_13 = arith.constant 0 : index
    %36 = vector.load %arg4[%c0_12, %c0_13] : memref<4x2xf32, #tpu.memory_space<vmem>>, vector<4x1xf32>
    %37 = vector.broadcast %36 : vector<4x1xf32> to vector<4x512xf32>
    %38 = arith.addf %35, %37 : vector<4x512xf32>
    %cst_14 = arith.constant 0.000000e+00 : f32
    %39 = vector.broadcast %cst_14 : f32 to vector<4x512xf32>
    %40 = arith.maximumf %38, %39 : vector<4x512xf32>
    %c0_15 = arith.constant 0 : index
    %c0_16 = arith.constant 0 : index
    %41 = vector.load %arg3[%c0_15, %c0_16] : memref<4x36xf32, #tpu.memory_space<vmem>>, vector<4x36xf32>
    %c17_i32_17 = arith.constant 17 : i32
    %42 = tpu.dynamic_rotate %40 by %c17_i32_17 dim 1 : vector<4x512xf32>, i32 -> vector<4x512xf32>
    %c0_18 = arith.constant 0 : index
    %c0_19 = arith.constant 0 : index
    %43 = vector.load %arg5[%c0_18, %c0_19] : memref<9x512xf32, #tpu.memory_space<vmem>>, vector<1x512xf32>
    %44 = vector.broadcast %43 : vector<1x512xf32> to vector<4x512xf32>
    %45 = arith.mulf %42, %44 : vector<4x512xf32>
    %c16_i32_20 = arith.constant 16 : i32
    %46 = tpu.dynamic_rotate %40 by %c16_i32_20 dim 1 : vector<4x512xf32>, i32 -> vector<4x512xf32>
    %c1_21 = arith.constant 1 : index
    %c0_22 = arith.constant 0 : index
    %47 = vector.load %arg5[%c1_21, %c0_22] : memref<9x512xf32, #tpu.memory_space<vmem>>, vector<1x512xf32>
    %48 = vector.broadcast %47 : vector<1x512xf32> to vector<4x512xf32>
    %49 = arith.mulf %46, %48 : vector<4x512xf32>
    %c15_i32_23 = arith.constant 15 : i32
    %50 = tpu.dynamic_rotate %40 by %c15_i32_23 dim 1 : vector<4x512xf32>, i32 -> vector<4x512xf32>
    %c2_24 = arith.constant 2 : index
    %c0_25 = arith.constant 0 : index
    %51 = vector.load %arg5[%c2_24, %c0_25] : memref<9x512xf32, #tpu.memory_space<vmem>>, vector<1x512xf32>
    %52 = vector.broadcast %51 : vector<1x512xf32> to vector<4x512xf32>
    %53 = arith.mulf %50, %52 : vector<4x512xf32>
    %c1_i32_26 = arith.constant 1 : i32
    %54 = tpu.dynamic_rotate %40 by %c1_i32_26 dim 1 : vector<4x512xf32>, i32 -> vector<4x512xf32>
    %c3_27 = arith.constant 3 : index
    %c0_28 = arith.constant 0 : index
    %55 = vector.load %arg5[%c3_27, %c0_28] : memref<9x512xf32, #tpu.memory_space<vmem>>, vector<1x512xf32>
    %56 = vector.broadcast %55 : vector<1x512xf32> to vector<4x512xf32>
    %57 = arith.mulf %54, %56 : vector<4x512xf32>
    %c511_i32_29 = arith.constant 511 : i32
    %58 = tpu.dynamic_rotate %40 by %c511_i32_29 dim 1 : vector<4x512xf32>, i32 -> vector<4x512xf32>
    %c5_30 = arith.constant 5 : index
    %c0_31 = arith.constant 0 : index
    %59 = vector.load %arg5[%c5_30, %c0_31] : memref<9x512xf32, #tpu.memory_space<vmem>>, vector<1x512xf32>
    %60 = vector.broadcast %59 : vector<1x512xf32> to vector<4x512xf32>
    %61 = arith.mulf %58, %60 : vector<4x512xf32>
    %c497_i32_32 = arith.constant 497 : i32
    %62 = tpu.dynamic_rotate %40 by %c497_i32_32 dim 1 : vector<4x512xf32>, i32 -> vector<4x512xf32>
    %c6_33 = arith.constant 6 : index
    %c0_34 = arith.constant 0 : index
    %63 = vector.load %arg5[%c6_33, %c0_34] : memref<9x512xf32, #tpu.memory_space<vmem>>, vector<1x512xf32>
    %64 = vector.broadcast %63 : vector<1x512xf32> to vector<4x512xf32>
    %65 = arith.mulf %62, %64 : vector<4x512xf32>
    %c496_i32_35 = arith.constant 496 : i32
    %66 = tpu.dynamic_rotate %40 by %c496_i32_35 dim 1 : vector<4x512xf32>, i32 -> vector<4x512xf32>
    %c7_36 = arith.constant 7 : index
    %c0_37 = arith.constant 0 : index
    %67 = vector.load %arg5[%c7_36, %c0_37] : memref<9x512xf32, #tpu.memory_space<vmem>>, vector<1x512xf32>
    %68 = vector.broadcast %67 : vector<1x512xf32> to vector<4x512xf32>
    %69 = arith.mulf %66, %68 : vector<4x512xf32>
    %c495_i32_38 = arith.constant 495 : i32
    %70 = tpu.dynamic_rotate %40 by %c495_i32_38 dim 1 : vector<4x512xf32>, i32 -> vector<4x512xf32>
    %c8_39 = arith.constant 8 : index
    %c0_40 = arith.constant 0 : index
    %71 = vector.load %arg5[%c8_39, %c0_40] : memref<9x512xf32, #tpu.memory_space<vmem>>, vector<1x512xf32>
    %72 = vector.broadcast %71 : vector<1x512xf32> to vector<4x512xf32>
    %73 = arith.mulf %70, %72 : vector<4x512xf32>
    %74 = tpu.concatenate %45, %49, %53, %57, %40, %61, %65, %69, %73 in 0 : vector<4x512xf32>, vector<4x512xf32>, vector<4x512xf32>, vector<4x512xf32>, vector<4x512xf32>, vector<4x512xf32>, vector<4x512xf32>, vector<4x512xf32>, vector<4x512xf32> -> vector<36x512xf32>
    %cst_41 = arith.constant dense<0.000000e+00> : vector<4x512xf32>
    %75 = tpu.matmul %41, %74, %cst_41 {dimension_numbers = #tpu.dot_dimension_numbers<[1], [0], [0], [1], [0, 0, 1, 1], [], []>} : vector<4x36xf32>, vector<36x512xf32>, vector<4x512xf32> -> vector<4x512xf32>
    %c0_42 = arith.constant 0 : index
    %c1_43 = arith.constant 1 : index
    %76 = vector.load %arg4[%c0_42, %c1_43] : memref<4x2xf32, #tpu.memory_space<vmem>>, vector<4x1xf32>
    %77 = vector.broadcast %76 : vector<4x1xf32> to vector<4x512xf32>
    %78 = arith.addf %75, %77 : vector<4x512xf32>
    %79 = arith.addf %78, %0 : vector<4x512xf32>
    %cst_44 = arith.constant 0.000000e+00 : f32
    %80 = vector.broadcast %cst_44 : f32 to vector<4x512xf32>
    %81 = arith.maximumf %79, %80 : vector<4x512xf32>
    %c0_45 = arith.constant 0 : index
    %c0_46 = arith.constant 0 : index
    %82 = vector.load %arg6[%c0_45, %c0_46] : memref<4x512xf32, #tpu.memory_space<vmem>>, vector<4x512xf32>
    tpu.vector_store %arg6[%c0_45, %c0_46], %81 {strides = array<i32>} : memref<4x512xf32, #tpu.memory_space<vmem>>, vector<4x512xf32>,
    return
  }
  func.func @transform_0(%arg0: i32) -> (i32, i32) {
    %c0_i32 = arith.constant 0 : i32
    %c0_i32_0 = arith.constant 0 : i32
    %c0_i32_1 = arith.constant 0 : i32
    return %c0_i32, %c0_i32_0 : i32, i32
  }
  func.func @transform_1(%arg0: i32) -> (i32, i32) {
    %c0_i32 = arith.constant 0 : i32
    %c0_i32_0 = arith.constant 0 : i32
    %c0_i32_1 = arith.constant 0 : i32
    return %c0_i32, %c0_i32_0 : i32, i32
  }
  func.func @transform_2(%arg0: i32) -> (i32, i32) {
    %c0_i32 = arith.constant 0 : i32
    %c0_i32_0 = arith.constant 0 : i32
    %c0_i32_1 = arith.constant 0 : i32
    return %c0_i32, %c0_i32_0 : i32, i32
  }
  func.func @transform_3(%arg0: i32) -> (i32, i32) {
    %c0_i32 = arith.constant 0 : i32
    %c0_i32_0 = arith.constant 0 : i32
    %c0_i32_1 = arith.constant 0 : i32
    return %c0_i32, %c0_i32_0 : i32, i32
  }
  func.func @transform_4(%arg0: i32) -> (i32, i32) {
    %c0_i32 = arith.constant 0 : i32
    %c0_i32_0 = arith.constant 0 : i32
    %c0_i32_1 = arith.constant 0 : i32
    return %c0_i32, %c0_i32_0 : i32, i32
  }
  func.func @transform_5(%arg0: i32) -> (i32, i32) {
    %c0_i32 = arith.constant 0 : i32
    %c0_i32_0 = arith.constant 0 : i32
    %c0_i32_1 = arith.constant 0 : i32
    return %c0_i32, %c0_i32_0 : i32, i32
  }
}

</mosaic_0001>

<bundles_post_ra>
// kernel: basic_block_forward.1
= control target key start
LH: loop header
LB: loop body
LE: loop exit
PB: predicated region body
PF: predicated region fallthrough
CT: control target
= control target key end

     0   :  { %s883_s22 = smov 17   ;;  %s885_s23 = smov 15   ;;  %v44_v35 = vlaneseq  ;;  %vm397_vm6 = vcmask 1043456   ;;  %vm420_vm9 = vcmask 293888   ;;  %s1592_s0 = inlined_call_operand.vmem [shape: f32[4,512], index: 0, kind: input, shape index: {}]   ;;  %s1593_s4 = inlined_call_operand.vmem [shape: f32[9,512], index: 4, kind: input, shape index: {}]   ;;  %s1594_s3 = inlined_call_operand.vmem [shape: f32[4,2], index: 3, kind: input, shape index: {}]   ;;  %s1595_s1 = inlined_call_operand.vmem [shape: f32[4,36], index: 1, kind: input, shape index: {}]   ;;  %s1596_s2 = inlined_call_operand.vmem [shape: f32[4,36], index: 2, kind: input, shape index: {}]   ;;  %s1597_s5 = inlined_call_operand.vmem [shape: f32[4,512], index: 5, kind: output, shape index: {}]  }
   0x1   :  { %v926_v0 = vld [vmem:[%s1592_s0 + $0x8] sm:$0xff]  ;;  %v931_v1 = vld [vmem:[%s1592_s0] sm:$0xff]  ;;  %s884_s0 = smov 16   ;;  %s886_s24 = smov 1  }
   0x2   :  { %27 = vst [vmem:[#allocation1 + $0x10] ss:$2 sm:$0xff] %v926_v0  ;;  %s887_s25 = smov 127   ;;  %s888_s26 = smov 113   ;;  %v992_v36 = vand.u32 127, %v44_v35 }
   0x3   :  { %25 = vst [vmem:[#allocation1] ss:$2 sm:$0xff] %v931_v1  ;;  %s889_s27 = smov 112   ;;  %s890_s28 = smov 111  }
   0x4   :  { %vm84_vm0 = vcmp.lt.s32.totalorder %v992_v36, 16  ;;  %v1046_v62 = vld [vmem:[%s1593_s4 + $0x1] ss:$8 sm:$0xf]  ;;  %vm46_vm1 = vcmp.lt.s32.totalorder %v992_v36, 17  ;;  %vm279_vm2 = vcmp.lt.s32.totalorder %v992_v36, 112 }
   0x5   :  { %v1599_v63 = vperm.slane %v1046_v62, 2  ;;  %vm162_vm3 = vcmp.lt.s32.totalorder %v992_v36, 1  ;;  %vm201_vm4 = vcmp.lt.s32.totalorder %v992_v36, 127  ;;  %vm123_vm5 = vcmp.lt.s32.totalorder %v992_v36, 15 }
   0x6   :  { %vm240_vm7 = vcmp.lt.s32.totalorder %v992_v36, 113  ;;  %vm318_vm8 = vcmp.lt.s32.totalorder %v992_v36, 111 }
   0x9   :  { %v30_v2 = vld.sshfl [vmem:[#allocation1 + $0x10] sm:$0xff pattern:$0x75316420]  ;;  %v31_v3 = vld.sshfl [vmem:[#allocation1 + $0x18] sm:$0xff pattern:$0x75316420] }
   0xa   :  { %40 = vrot.lane.b32.xlu0 %v30_v2, %s883_s22  ;;  %42 = vrot.lane.b32.xlu1 %v31_v3, %s883_s22  ;;  %67 = vst [vmem:[#allocation1 + $0x10] ss:$2 sm:$0xff] %v926_v0  ;;  %v938_v4 = vld.sshfl [vmem:[#allocation1] sm:$0xff pattern:$0x75316420] }
   0xb   :  { %v940_v5 = vld.sshfl [vmem:[#allocation1 + $0x8] sm:$0xff pattern:$0x75316420] }
   0xc   :  { %65 = vst [vmem:[#allocation1] ss:$2 sm:$0xff] %v931_v1  ;;  %v1062_v2 = vld [vmem:[%s1593_s4 + $0x3] ss:$8 sm:$0xf] }
  0x11   :  { %v71_v6 = vld.sshfl [vmem:[#allocation1 + $0x18] sm:$0xff pattern:$0x75316420]  ;;  %v70_v7 = vld.sshfl [vmem:[#allocation1 + $0x10] sm:$0xff pattern:$0x75316420] }
  0x12   :  { %82 = vrot.lane.b32.xlu0 %v71_v6, %s884_s0  ;;  %80 = vrot.lane.b32.xlu2 %v70_v7, %s884_s0  ;;  %106 = vst [vmem:[#allocation1 + $0x10] ss:$2 sm:$0xff] %v926_v0  ;;  %v1598_v6 = vperm.slane %v1046_v62, 3 }
  0x13   :  { %v69_v8 = vld.sshfl [vmem:[#allocation1 + $0x8] sm:$0xff pattern:$0x75316420]  ;;  %v946_v9 = vld.sshfl [vmem:[#allocation1] sm:$0xff pattern:$0x75316420] }
  0x14   :  { %104 = vst [vmem:[#allocation1] ss:$2 sm:$0xff] %v931_v1 }
  0x19   :  { %v109_v10 = vld.sshfl [vmem:[#allocation1 + $0x10] sm:$0xff pattern:$0x75316420]  ;;  %v110_v11 = vld.sshfl [vmem:[#allocation1 + $0x18] sm:$0xff pattern:$0x75316420] }
  0x1a   :  { %119 = vrot.lane.b32.xlu1 %v109_v10, %s885_s23  ;;  %145 = vst [vmem:[#allocation1 + $0x10] ss:$2 sm:$0xff] %v926_v0  ;;  %78 = vrot.lane.b32.xlu2 %v69_v8, %s884_s0  ;;  %v1079_v10 = vld [vmem:[%s1593_s4 + $0x5] ss:$8 sm:$0xf]  ;;  %v891_v8 = vmov 0  }
  0x1b   :  { %v108_v12 = vld.sshfl [vmem:[#allocation1 + $0x8] sm:$0xff pattern:$0x75316420]  ;;  %v107_v13 = vld.sshfl [vmem:[#allocation1] sm:$0xff pattern:$0x75316420]  ;;  %880 = vset.pattern.permute.xlu2 %v891_v8 }
  0x1c   :  { %117 = vrot.lane.b32.xlu0 %v108_v12, %s885_s23  ;;  %143 = vst [vmem:[#allocation1] ss:$2 sm:$0xff] %v931_v1 }
  0x21   :  { %v148_v14 = vld.sshfl [vmem:[#allocation1 + $0x10] sm:$0xff pattern:$0x75316420]  ;;  %v149_v15 = vld.sshfl [vmem:[#allocation1 + $0x18] sm:$0xff pattern:$0x75316420] }
  0x22   :  { %158 = vrot.lane.b32.xlu1 %v148_v14, %s886_s24  ;;  %121 = vrot.lane.b32.xlu2 %v110_v11, %s885_s23  ;;  %184 = vst [vmem:[#allocation1 + $0x10] ss:$2 sm:$0xff] %v926_v0 }
  0x23   :  { %v147_v16 = vld.sshfl [vmem:[#allocation1 + $0x8] sm:$0xff pattern:$0x75316420]  ;;  %v146_v17 = vld.sshfl [vmem:[#allocation1] sm:$0xff pattern:$0x75316420] }
  0x24   :  { %156 = vrot.lane.b32.xlu0 %v147_v16, %s886_s24  ;;  %182 = vst [vmem:[#allocation1] ss:$2 sm:$0xff] %v931_v1  ;;  %v172_v16 = vperm.slane %v1062_v2, 2 }
  0x29   :  { %v188_v18 = vld.sshfl [vmem:[#allocation1 + $0x18] sm:$0xff pattern:$0x75316420]  ;;  %v187_v19 = vld.sshfl [vmem:[#allocation1 + $0x10] sm:$0xff pattern:$0x75316420] }
  0x2a   :  { %160 = vrot.lane.b32.xlu2 %v149_v15, %s886_s24  ;;  %223 = vst [vmem:[#allocation1 + $0x10] ss:$2 sm:$0xff] %v926_v0 }
  0x2b   :  { %v186_v20 = vld.sshfl [vmem:[#allocation1 + $0x8] sm:$0xff pattern:$0x75316420]  ;;  %v185_v21 = vld.sshfl [vmem:[#allocation1] sm:$0xff pattern:$0x75316420] }
  0x2c   :  { %197 = vrot.lane.b32.xlu0 %v187_v19, %s887_s25  ;;  %195 = vrot.lane.b32.xlu1 %v186_v20, %s887_s25  ;;  %221 = vst [vmem:[#allocation1] ss:$2 sm:$0xff] %v931_v1 }
  0x31   :  { %v227_v22 = vld.sshfl [vmem:[#allocation1 + $0x18] sm:$0xff pattern:$0x75316420]  ;;  %v226_v23 = vld.sshfl [vmem:[#allocation1 + $0x10] sm:$0xff pattern:$0x75316420] }
  0x32   :  { %193 = vrot.lane.b32.xlu2 %v185_v21, %s887_s25  ;;  %262 = vst [vmem:[#allocation1 + $0x10] ss:$2 sm:$0xff] %v926_v0 }
  0x33   :  { %v224_v24 = vld.sshfl [vmem:[#allocation1] sm:$0xff pattern:$0x75316420]  ;;  %v225_v25 = vld.sshfl [vmem:[#allocation1 + $0x8] sm:$0xff pattern:$0x75316420] }
  0x34   :  { %238 = vrot.lane.b32.xlu1 %v227_v22, %s888_s26  ;;  %232 = vrot.lane.b32.xlu0 %v224_v24, %s888_s26  ;;  %260 = vst [vmem:[#allocation1] ss:$2 sm:$0xff] %v931_v1  ;;  %v211_v22 = vperm.slane %v1079_v10, 2  ;;  %v1603_v24 = vperm.slane %v1079_v10, 1 }
  0x39   :  { %v266_v26 = vld.sshfl [vmem:[#allocation1 + $0x18] sm:$0xff pattern:$0x75316420]  ;;  %v265_v27 = vld.sshfl [vmem:[#allocation1 + $0x10] sm:$0xff pattern:$0x75316420] }
  0x3a   :  { %199 = vrot.lane.b32.xlu2 %v188_v18, %s887_s25  ;;  %301 = vst [vmem:[#allocation1 + $0x10] ss:$2 sm:$0xff] %v926_v0  ;;  %v1094_v18 = vld [vmem:[%s1593_s4 + $0x6] ss:$8 sm:$0xf] }
  0x3b   :  { %v263_v28 = vld.sshfl [vmem:[#allocation1] sm:$0xff pattern:$0x75316420]  ;;  %v264_v29 = vld.sshfl [vmem:[#allocation1 + $0x8] sm:$0xff pattern:$0x75316420] }
  0x3c   :  { %236 = vrot.lane.b32.xlu1 %v226_v23, %s888_s26  ;;  %271 = vrot.lane.b32.xlu0 %v263_v28, %s889_s27  ;;  %299 = vst [vmem:[#allocation1] ss:$2 sm:$0xff] %v931_v1  ;;  %v1602_v23 = vperm.slane %v1079_v10, 0 }
  0x41   :  { %v304_v30 = vld.sshfl [vmem:[#allocation1 + $0x10] sm:$0xff pattern:$0x75316420]  ;;  %v305_v31 = vld.sshfl [vmem:[#allocation1 + $0x18] sm:$0xff pattern:$0x75316420] }
  0x42   :  { %234 = vrot.lane.b32.xlu2 %v225_v25, %s888_s26  ;;  %364 = vst [vmem:[#allocation1 + $0x10] ss:$2 sm:$0xff] %v926_v0  ;;  %v1114_v25 = vld [vmem:[%s1593_s4 + $0x20] ss:$8 sm:$0xf] }
  0x43   :  { %v302_v32 = vld.sshfl [vmem:[#allocation1] sm:$0xff pattern:$0x75316420]  ;;  %v303_v33 = vld.sshfl [vmem:[#allocation1 + $0x8] sm:$0xff pattern:$0x75316420] }
  0x44   :  { %273 = vrot.lane.b32.xlu1 %v264_v29, %s889_s27  ;;  %277 = vrot.lane.b32.xlu0 %v266_v26, %s889_s27  ;;  %362 = vst [vmem:[#allocation1] ss:$2 sm:$0xff] %v931_v1  ;;  %v248_v29 = vperm.slane %v1094_v18, 0  ;;  %v327_v35 = vperm.slane %v1114_v25, 1 }
  0x49   :  { %v1022_v49 = vld.sshfl [vmem:[#allocation1 + $0x10] sm:$0xff pattern:$0x75316420]  ;;  %v1024_v50 = vld.sshfl [vmem:[#allocation1 + $0x18] sm:$0xff pattern:$0x75316420] }
  0x4a   :  { %275 = vrot.lane.b32.xlu2 %v265_v27, %s889_s27  ;;  %814 = vst [vmem:[#allocation1 + $0x10] ss:$2 sm:$0xff] %v926_v0  ;;  %v1052_v0 = vld [vmem:[%s1593_s4] ss:$8 sm:$0xf] }
  0x4b   :  { %v1004_v41 = vld.sshfl [vmem:[#allocation1] sm:$0xff pattern:$0x75316420]  ;;  %v1006_v42 = vld.sshfl [vmem:[#allocation1 + $0x8] sm:$0xff pattern:$0x75316420] }
  0x4c   :  { %314 = vrot.lane.b32.xlu0 %v304_v30, %s890_s28  ;;  %310 = vrot.lane.b32.xlu1 %v302_v32, %s890_s28  ;;  %812 = vst [vmem:[#allocation1] ss:$2 sm:$0xff] %v931_v1  ;;  %v1057_v1 = vld [vmem:[%s1593_s4 + $0x2] ss:$8 sm:$0xf] }
  0x52   :  { %312 = vrot.lane.b32.xlu2 %v303_v33, %s890_s28  ;;  %v249_v33 = vperm.slane %v1094_v18, 1 }
  0x54   :  { %38 = vrot.lane.b32.xlu0 %v940_v5, %s883_s22  ;;  %316 = vrot.lane.b32.xlu1 %v305_v31, %s890_s28 }
  0x5a   :  { %76 = vrot.lane.b32.xlu2 %v946_v9, %s884_s0  ;;  %v173_v9 = vperm.slane %v1062_v2, 3 }
  0x5c   :  { %115 = vrot.lane.b32.xlu0 %v107_v13, %s885_s23  ;;  %154 = vrot.lane.b32.xlu1 %v146_v17, %s886_s24  ;;  %v212_v17 = vperm.slane %v1079_v10, 3 }
  0x64   :  { %36 = vrot.lane.b32.xlu1 %v938_v4, %s883_s22  ;;  %v1067_v4 = vld [vmem:[%s1593_s4 + $0x7] ss:$8 sm:$0xf] }
  0x65   :  { %v1601_v14 = vperm.slane %v1067_v4, 0  ;;  %v1600_v15 = vperm.slane %v1067_v4, 1 }
  0x6c   :  { %v81_v34 = vpop.permute.xlu2 %80 }
  0x74   :  { %v995_v37 = vpop.permute.xlu2 %78 }
  0x75   :  { %v86_v38 = vsel %vm84_vm0, %v995_v37, %v81_v34 }
  0x76   :  { %v1083_v13 = vmul.f32 %v1599_v63, %v86_v38  ;;  %v1139_v38 = vld [vmem:[%s1594_s3] sm:$0xf]  ;;  %v289_v63 = vperm.slane %v1067_v4, 2 }
  0x77   :  { %417 = vperm.xlu2 %880, %v1139_v38  }
  0x7c   :  { %v1000_v39 = vpop.permute.xlu0 %40  ;;  %v1002_v40 = vpop.permute.xlu2 %121 }
  0x7d   :  { %v1008_v43 = vpop.permute.xlu1 %42 }
  0x7e   :  { %v1105_v21 = vsel %vm46_vm1, %v1000_v39, %v1008_v43 }
  0x84   :  { %v1010_v44 = vpop.permute.xlu0 %82  ;;  %v1016_v46 = vpop.permute.xlu2 %160 }
  0x85   :  { %v85_v45 = vsel %vm84_vm0, %v81_v34, %v1010_v44  ;;  %v326_v34 = vperm.slane %v1114_v25, 0 }
  0x86   :  { %v1118_v26 = vmul.f32 %v1598_v6, %v85_v45 }
  0x8c   :  { %v1018_v47 = vpop.permute.xlu1 %119  ;;  %v194_v52 = vpop.permute.xlu2 %193 }
  0x8e   :  { %v1020_v48 = vpop.permute.xlu0 %117 }
  0x94   :  { %v1027_v51 = vpop.permute.xlu1 %158  ;;  %v1033_v56 = vpop.permute.xlu2 %199 }
  0x95   :  { %v205_v45 = vsel %vm201_vm4, %v1033_v56, %v194_v52 }
  0x96   :  { %v1029_v53 = vpop.permute.xlu0 %156 }
  0x9c   :  { %v235_v59 = vpop.permute.xlu2 %234 }
  0x9e   :  { %v1031_v54 = vpop.permute.xlu0 %197  ;;  %v196_v55 = vpop.permute.xlu1 %195 }
  0x9f   :  { %v203_v27 = vsel %vm201_vm4, %v196_v55, %v1031_v54  ;;  %v204_v28 = vsel %vm201_vm4, %v194_v52, %v196_v55 }
  0xa0   :  { %v217_v55 = vmul.f32 %v1602_v23, %v204_v28 }
  0xa4   :  { %v276_v3 = vpop.permute.xlu2 %275 }
  0xa6   :  { %v1035_v57 = vpop.permute.xlu1 %238  ;;  %v1037_v58 = vpop.permute.xlu0 %232 }
  0xae   :  { %v1039_v60 = vpop.permute.xlu1 %236  ;;  %v1041_v61 = vpop.permute.xlu0 %271 }
  0xaf   :  { %v242_v6 = vsel %vm240_vm7, %v235_v59, %v1039_v60 }
  0xb0   :  { %v257_v30 = vmul.f32 %v249_v33, %v242_v6 }
  0xb6   :  { %v274_v11 = vpop.permute.xlu1 %273  ;;  %v278_v12 = vpop.permute.xlu0 %277 }
  0xb7   :  { %v281_v19 = vsel %vm279_vm2, %v274_v11, %v276_v3  ;;  %v282_v20 = vsel %vm279_vm2, %v1041_v61, %v274_v11  ;;  %v218_v11 = vmul.f32 %v1603_v24, %v203_v27  ;;  %v283_v7 = vsel %vm279_vm2, %v278_v12, %v1041_v61 }
  0xb8   :  { %v295_v31 = vmul.f32 %v1601_v14, %v282_v20  ;;  %v296_v32 = vmul.f32 %v1600_v15, %v281_v19  ;;  %v313_v19 = vpop.permute.xlu2 %312  ;;  %v243_v20 = vsel %vm240_vm7, %v1037_v58, %v235_v59  ;;  %v290_v15 = vperm.slane %v1067_v4, 3 }
  0xb9   :  { %v280_v59 = vsel %vm279_vm2, %v276_v3, %v278_v12  ;;  %v378_v5 = vrot.slane %v218_v11, 4  ;;  %v163_v3 = vsel %vm162_vm3, %v1027_v51, %v1016_v46  ;;  %v164_v61 = vsel %vm162_vm3, %v1029_v53, %v1027_v51 }
  0xba   :  { %v389_v28 = vrot.slane %v295_v31, 4  ;;  %v390_v23 = vrot.slane %v296_v32, 4  ;;  %v377_v32 = vrot.slane %v217_v55, 4  ;;  %v202_v12 = vsel %vm201_vm4, %v1031_v54, %v1033_v56 }
  0xbb   :  { %v297_v6 = vmul.f32 %v289_v63, %v280_v59  ;;  %v298_v55 = vmul.f32 %v290_v15, %v283_v7  ;;  %v124_v54 = vsel %vm123_vm5, %v1018_v47, %v1002_v40  ;;  %v220_v56 = vmul.f32 %v212_v17, %v205_v45 }
  0xbc   :  { %v411_v51 = vsel %vm397_vm6, %v257_v30, %v390_v23  ;;  %v181_v7 = vmul.f32 %v173_v9, %v163_v3  ;;  %v219_v23 = vmul.f32 %v211_v22, %v202_v12  ;;  %v406_v30 = vsel %vm397_vm6, %v1004_v41, %v377_v32 }
  0xbd   :  { %v344_v45 = vrot.slane %v1083_v13, 4  ;;  %v180_v59 = vmul.f32 %v172_v16, %v164_v61  ;;  %v380_v61 = vrot.slane %v220_v56, 4 }
  0xbe   :  { %v315_v52 = vpop.permute.xlu0 %314  ;;  %v311_v14 = vpop.permute.xlu1 %310  ;;  %v379_v12 = vrot.slane %v219_v23, 4  ;;  %v345_v23 = vrot.slane %v1118_v26, 4  ;;  %v93_v26 = vperm.slane %v1046_v62, 1 }
  0xbf   :  { %v320_v27 = vsel %vm318_vm8, %v313_v19, %v315_v52  ;;  %v321_v24 = vsel %vm318_vm8, %v311_v14, %v313_v19  ;;  %v256_v19 = vmul.f32 %v248_v29, %v243_v20  ;;  %v328_v20 = vperm.slane %v1114_v25, 2 }
  0xc0   :  { %v334_v8 = vmul.f32 %v326_v34, %v321_v24  ;;  %v335_v31 = vmul.f32 %v327_v35, %v320_v27  ;;  %v250_v24 = vperm.slane %v1094_v18, 2  ;;  %v329_v27 = vperm.slane %v1114_v25, 3 }
  0xc1   :  { %v410_v11 = vsel %vm397_vm6, %v256_v19, %v389_v28  ;;  %v407_v28 = vsel %vm397_vm6, %v1006_v42, %v378_v5  ;;  %v391_v42 = vrot.slane %v297_v6, 4  ;;  %v392_v5 = vrot.slane %v298_v55, 4 }
  0xc2   :  { %854 = vmatpush.msk.msra.mxu0 %vm397_vm6, %v334_v8  ;;  %856 = vmatpush.msk.msra.mxu1 %vm397_vm6, %v335_v31  ;;  %v244_v8 = vsel %vm240_vm7, %v1035_v57, %v1037_v58  ;;  %v241_v31 = vsel %vm240_vm7, %v1039_v60, %v1035_v57  ;;  %v125_v58 = vsel %vm123_vm5, %v1020_v48, %v1018_v47  ;;  %v1604_v6 = vperm.slane %v1094_v18, 3 }
  0xc3   :  { %v356_v56 = vrot.slane %v180_v59, 4 }
  0xc4   :  { %448 = vmatpush.msra.mxu0 %v410_v11  ;;  %468 = vmatpush.msra.mxu1 %v411_v51  ;;  %v259_v55 = vmul.f32 %v1604_v6, %v244_v8  ;;  %v1605_v11 = vperm.slane %v1052_v0, 3  ;;  %v357_v51 = vrot.slane %v181_v7, 4  ;;  %v1607_v7 = vperm.slane %v1057_v1, 2 }
  0xc6   :  { %v1222_v19 = vpop.permute.xlu0 %38  ;;  %v317_v41 = vpop.permute.xlu1 %316  ;;  %449 = vmatpush.msra.mxu0 %v406_v30  ;;  %469 = vmatpush.msra.mxu1 %v407_v28  ;;  %v64_v47 = vmul.f32 %v1605_v11, %v1105_v21  ;;  %v1606_v28 = vperm.slane %v1057_v1, 3  ;;  %v413_v21 = vsel %vm397_vm6, %v259_v55, %v392_v5  ;;  %v141_v59 = vmul.f32 %v1607_v7, %v125_v58 }
  0xc7   :  { %v319_v32 = vsel %vm318_vm8, %v315_v52, %v317_v41  ;;  %v322_v3 = vsel %vm318_vm8, %v317_v41, %v311_v14  ;;  %v258_v52 = vmul.f32 %v250_v24, %v241_v31  ;;  %v55_v14 = vperm.slane %v1052_v0, 2 }
  0xc8   :  { %v336_v57 = vmul.f32 %v328_v20, %v319_v32  ;;  %v337_v60 = vmul.f32 %v329_v27, %v322_v3  ;;  %v48_v30 = vsel %vm46_vm1, %v1222_v19, %v1000_v39  ;;  %v142_v8 = vmul.f32 %v1606_v28, %v124_v54  ;;  %v77_v3 = vpop.permute.xlu2 %76 }
  0xc9   :  { %v412_v31 = vsel %vm397_vm6, %v258_v52, %v391_v42  ;;  %v92_v41 = vperm.slane %v1046_v62, 0  ;;  %v170_v39 = vperm.slane %v1062_v2, 0  ;;  %v171_v32 = vperm.slane %v1062_v2, 1 }
  0xca   :  { %858 = vmatpush.msk.msra.mxu2 %vm397_vm6, %v336_v57  ;;  %860 = vmatpush.msk.msra.mxu3 %vm397_vm6, %v337_v60  ;;  %v63_v54 = vmul.f32 %v55_v14, %v48_v30  ;;  %v408_v42 = vsel %vm397_vm6, %v1022_v49, %v379_v12  ;;  %v409_v5 = vsel %vm397_vm6, %v1024_v50, %v380_v61  ;;  %v131_v58 = vperm.slane %v1057_v1, 0 }
  0xcb   :  { %v132_v57 = vperm.slane %v1057_v1, 1  ;;  %v404_v55 = vsel %vm397_vm6, %v141_v59, %v356_v56  ;;  %v405_v52 = vsel %vm397_vm6, %v142_v8, %v357_v51  ;;  %v88_v12 = vsel %vm84_vm0, %v1010_v44, %v77_v3 }
  0xcc   :  { %488 = vmatpush.msra.mxu2 %v412_v31  ;;  %508 = vmatpush.msra.mxu3 %v413_v21  ;;  %v400_v44 = vsel %vm397_vm6, %v63_v54, %v344_v45  ;;  %v100_v31 = vmul.f32 %v92_v41, %v88_v12 }
  0xce   :  { %v116_v60 = vpop.permute.xlu0 %115  ;;  %489 = vmatpush.msra.mxu2 %v408_v42  ;;  %509 = vmatpush.msra.mxu3 %v409_v5  ;;  %v155_v6 = vpop.permute.xlu1 %154 }
  0xcf   :  { %v126_v11 = vsel %vm123_vm5, %v116_v60, %v1020_v48  ;;  %v127_v49 = vsel %vm123_vm5, %v1002_v40, %v116_v60  ;;  %v165_v50 = vsel %vm162_vm3, %v155_v6, %v1029_v53  ;;  %v166_v61 = vsel %vm162_vm3, %v1016_v46, %v155_v6  ;;  %v22_v40 = vld [vmem:[%s1595_s1] sm:$0xf] }
  0xd0   :  { %v178_v51 = vmul.f32 %v170_v39, %v166_v61  ;;  %v179_v48 = vmul.f32 %v171_v32, %v165_v50  ;;  %490 = vmatpush.msra.mxu2 %v404_v55  ;;  %v87_v46 = vsel %vm84_vm0, %v77_v3, %v995_v37  ;;  %510 = vmatpush.msra.mxu3 %v405_v52  ;;  %v53_v37 = vperm.slane %v1052_v0, 0 }
  0xd1   :  { %v401_v53 = vsel %vm397_vm6, %v64_v47, %v345_v23  ;;  %v139_v56 = vmul.f32 %v131_v58, %v127_v49  ;;  %v140_v30 = vmul.f32 %v132_v57, %v126_v11  ;;  %v101_v13 = vmul.f32 %v93_v26, %v87_v46 }
  0xd2   :  { %v354_v28 = vrot.slane %v178_v51, 4  ;;  %v355_v8 = vrot.slane %v179_v48, 4  ;;  %491 = vmatpush.msra.mxu2 %v400_v44  ;;  %511 = vmatpush.msra.mxu3 %v401_v53  ;;  %v54_v23 = vperm.slane %v1052_v0, 1  ;;  %v342_v3 = vrot.slane %v100_v31, 4 }
  0xd3   :  { %859 = vmatmul.msk.f32.vlgmr.msra.gmra.mxu2 %vm420_vm9, %v22_v40  ;;  %861 = vmatmul.msk.f32.vlgmr.msra.gmra.mxu3 %vm420_vm9, %v22_v40  ;;  %v343_v54 = vrot.slane %v101_v13, 4 }
  0xd4   :  { %v402_v45 = vsel %vm397_vm6, %v139_v56, %v354_v28  ;;  %v403_v47 = vsel %vm397_vm6, %v140_v30, %v355_v8 }
  0xd5   :  { %450 = vmatpush.msra.mxu0 %v402_v45  ;;  %470 = vmatpush.msra.mxu1 %v403_v47 }
  0xd6   :  { %v37_v21 = vpop.permute.xlu1 %36 }
  0xd7   :  { %v49_v7 = vsel %vm46_vm1, %v37_v21, %v1222_v19  ;;  %v50_v59 = vsel %vm46_vm1, %v1008_v43, %v37_v21  ;;  %v418_v19 = vpop.permute.xlu2 %417 }
  0xd8   :  { %v61_v42 = vmul.f32 %v53_v37, %v50_v59  ;;  %v62_v5 = vmul.f32 %v54_v23, %v49_v7  ;;  %v1608_v7 = vperm.slane %v1067_v4, 0 }
  0xda   :  { %v398_v60 = vsel %vm397_vm6, %v61_v42, %v342_v3  ;;  %v399_v6 = vsel %vm397_vm6, %v62_v5, %v343_v54 }
  0xdb   :  { %451 = vmatpush.msra.mxu0 %v398_v60  ;;  %471 = vmatpush.msra.mxu1 %v399_v6 }
  0xdc   :  { %855 = vmatmul.msk.f32.vlgmr.msra.gmra.mxu0 %vm420_vm9, %v22_v40  ;;  %857 = vmatmul.msk.f32.vlgmr.msra.gmra.mxu1 %vm420_vm9, %v22_v40 }
 0x156   :  { %v513_v61 = vpop.f32.mrf.mxu3  ;;  %v493_v48 = vpop.f32.mrf.mxu2 }
 0x157   :  { %v514_v12 = vadd.f32 %v513_v61, %v418_v19  ;;  %v494_v40 = vadd.f32 %v493_v48, %v418_v19 }
 0x159   :  { %v453_v43 = vpop.f32.mrf.mxu0  ;;  %v473_v11 = vpop.f32.mrf.mxu1  ;;  %v1356_v51 = vmax.f32 %v514_v12, 0.0  ;;  %v1364_v46 = vmax.f32 %v494_v40, 0.0 }
 0x15a   :  { %v454_v55 = vadd.f32 %v453_v43, %v418_v19  ;;  %v474_v49 = vadd.f32 %v473_v11, %v418_v19  ;;  %v1609_v19 = vperm.slane %v1079_v10, 0 }
 0x15c   :  { %v1328_v52 = vmax.f32 %v454_v55, 0.0  ;;  %v1336_v50 = vmax.f32 %v474_v49, 0.0 }
 0x15e   :  { %585 = vrot.lane.b32.xlu1 %v1328_v52, %s887_s25  ;;  %633 = vrot.lane.b32.xlu2 %v1328_v52, %s890_s28 }
 0x15f   :  { %617 = vrot.lane.b32.xlu0 %v1328_v52, %s889_s27 }
 0x166   :  { %619 = vrot.lane.b32.xlu1 %v1336_v50, %s889_s27  ;;  %635 = vrot.lane.b32.xlu2 %v1336_v50, %s890_s28 }
 0x167   :  { %601 = vrot.lane.b32.xlu0 %v1328_v52, %s888_s26 }
 0x16e   :  { %587 = vrot.lane.b32.xlu1 %v1336_v50, %s887_s25  ;;  %539 = vrot.lane.b32.xlu2 %v1336_v50, %s884_s0 }
 0x16f   :  { %571 = vrot.lane.b32.xlu0 %v1336_v50, %s886_s24 }
 0x176   :  { %569 = vrot.lane.b32.xlu1 %v1328_v52, %s886_s24  ;;  %603 = vrot.lane.b32.xlu2 %v1336_v50, %s888_s26 }
 0x177   :  { %555 = vrot.lane.b32.xlu0 %v1336_v50, %s885_s23 }
 0x17e   :  { %623 = vrot.lane.b32.xlu1 %v1356_v51, %s889_s27  ;;  %591 = vrot.lane.b32.xlu2 %v1356_v51, %s887_s25 }
 0x17f   :  { %523 = vrot.lane.b32.xlu0 %v1336_v50, %s883_s22 }
 0x186   :  { %607 = vrot.lane.b32.xlu1 %v1356_v51, %s888_s26  ;;  %621 = vrot.lane.b32.xlu2 %v1364_v46, %s889_s27 }
 0x187   :  { %639 = vrot.lane.b32.xlu0 %v1356_v51, %s890_s28 }
 0x18e   :  { %573 = vrot.lane.b32.xlu1 %v1364_v46, %s886_s24  ;;  %575 = vrot.lane.b32.xlu2 %v1356_v51, %s886_s24 }
 0x18f   :  { %637 = vrot.lane.b32.xlu0 %v1364_v46, %s890_s28 }
 0x196   :  { %605 = vrot.lane.b32.xlu1 %v1364_v46, %s888_s26  ;;  %541 = vrot.lane.b32.xlu2 %v1364_v46, %s884_s0 }
 0x197   :  { %589 = vrot.lane.b32.xlu0 %v1364_v46, %s887_s25 }
 0x19e   :  { %557 = vrot.lane.b32.xlu1 %v1364_v46, %s885_s23  ;;  %559 = vrot.lane.b32.xlu2 %v1356_v51, %s885_s23 }
 0x19f   :  { %543 = vrot.lane.b32.xlu0 %v1356_v51, %s884_s0 }
 0x1a6   :  { %527 = vrot.lane.b32.xlu1 %v1356_v51, %s883_s22  ;;  %537 = vrot.lane.b32.xlu2 %v1328_v52, %s884_s0 }
 0x1a7   :  { %525 = vrot.lane.b32.xlu0 %v1364_v46, %s883_s22 }
 0x1ae   :  { %521 = vrot.lane.b32.xlu1 %v1328_v52, %s883_s22 }
 0x1af   :  { %553 = vrot.lane.b32.xlu0 %v1328_v52, %s885_s23 }
 0x1b8   :  { %v634_v44 = vpop.permute.xlu2 %633 }
 0x1c0   :  { %v636_v53 = vpop.permute.xlu2 %635 }
 0x1c1   :  { %v643_v56 = vsel %vm318_vm8, %v634_v44, %v636_v53 }
 0x1c2   :  { %v645_v30 = vmul.f32 %v643_v56, %v326_v34 }
 0x1c4   :  { %862 = vmatpush.msk.msrb.mxu0 %vm397_vm6, %v645_v30 }
 0x1c8   :  { %v1405_v28 = vpop.permute.xlu2 %539 }
 0x1d0   :  { %v586_v8 = vpop.permute.xlu1 %585  ;;  %v604_v45 = vpop.permute.xlu2 %603 }
 0x1d1   :  { %v618_v31 = vpop.permute.xlu0 %617 }
 0x1d8   :  { %v620_v13 = vpop.permute.xlu1 %619  ;;  %v592_v49 = vpop.permute.xlu2 %591 }
 0x1d9   :  { %v627_v47 = vsel %vm279_vm2, %v618_v31, %v620_v13  ;;  %v602_v21 = vpop.permute.xlu0 %601  ;;  %v596_v30 = vsel %vm201_vm4, %v592_v49, %v586_v8 }
 0x1da   :  { %v629_v59 = vmul.f32 %v627_v47, %v1608_v7  ;;  %v611_v3 = vsel %vm240_vm7, %v602_v21, %v604_v45 }
 0x1db   :  { %v613_v34 = vmul.f32 %v611_v3, %v248_v29 }
 0x1dc   :  { %v689_v54 = vrot.slane %v629_v59, 4 }
 0x1de   :  { %v709_v42 = vsel %vm397_vm6, %v613_v34, %v689_v54  ;;  %v1610_v34 = vperm.slane %v1094_v18, 3 }
 0x1df   :  { %744 = vmatpush.msrb.mxu0 %v709_v42 }
 0x1e0   :  { %v588_v5 = vpop.permute.xlu1 %587  ;;  %v622_v40 = vpop.permute.xlu2 %621 }
 0x1e1   :  { %v595_v60 = vsel %vm201_vm4, %v586_v8, %v588_v5  ;;  %v1418_v6 = vpop.permute.xlu0 %571 }
 0x1e2   :  { %v597_v43 = vmul.f32 %v595_v60, %v1609_v19 }
 0x1e4   :  { %v677_v55 = vrot.slane %v597_v43, 4  ;;  %v626_v43 = vsel %vm279_vm2, %v620_v13, %v622_v40 }
 0x1e6   :  { %v705_v11 = vsel %vm397_vm6, %v1328_v52, %v677_v55  ;;  %v600_v52 = vmul.f32 %v596_v30, %v212_v17  ;;  %v1611_v30 = vperm.slane %v1067_v4, 1 }
 0x1e7   :  { %745 = vmatpush.msrb.mxu0 %v705_v11 }
 0x1e8   :  { %v1424_v61 = vpop.permute.xlu1 %569  ;;  %v680_v60 = vrot.slane %v600_v52, 4 }
 0x1e9   :  { %v1426_v29 = vpop.permute.xlu0 %555 }
 0x1ea   :  { %v708_v19 = vsel %vm397_vm6, %v1356_v51, %v680_v60  ;;  %v630_v51 = vmul.f32 %v626_v43, %v1611_v30  ;;  %v1613_v43 = vperm.slane %v1057_v1, 2  ;;  %v1615_v30 = vperm.slane %v1046_v62, 2 }
 0x1f0   :  { %v624_v12 = vpop.permute.xlu1 %623 }
 0x1f1   :  { %v1428_v48 = vpop.permute.xlu0 %523  ;;  %v628_v56 = vsel %vm279_vm2, %v624_v12, %v618_v31 }
 0x1f2   :  { %v632_v47 = vmul.f32 %v628_v56, %v290_v15  ;;  %v1446_v15 = vpop.permute.xlu2 %575 }
 0x1f4   :  { %v692_v54 = vrot.slane %v632_v47, 4  ;;  %v690_v47 = vrot.slane %v630_v51, 4 }
 0x1f8   :  { %v608_v7 = vpop.permute.xlu1 %607 }
 0x1f9   :  { %v612_v59 = vsel %vm240_vm7, %v608_v7, %v602_v21  ;;  %v640_v3 = vpop.permute.xlu0 %639 }
 0x1fa   :  { %v616_v42 = vmul.f32 %v612_v59, %v1610_v34  ;;  %v644_v31 = vsel %vm318_vm8, %v640_v3, %v634_v44  ;;  %v625_v44 = vsel %vm279_vm2, %v622_v40, %v624_v12  ;;  %v542_v40 = vpop.permute.xlu2 %541  ;;  %v892_v34 = vmov 1  }
 0x1fb   :  { %v648_v8 = vmul.f32 %v644_v31, %v329_v27  ;;  %v631_v13 = vmul.f32 %v625_v44, %v289_v63  ;;  %881 = vset.pattern.permute.xlu2 %v892_v34  ;;  %882 = vset.pattern.permute.xlu0 %v892_v34  ;;  %v1614_v44 = vperm.slane %v1057_v1, 3 }
 0x1fc   :  { %v712_v17 = vsel %vm397_vm6, %v616_v42, %v692_v54  ;;  %714 = vperm.xlu2 %881, %v1139_v38  }
 0x1fd   :  { %868 = vmatpush.msk.msrb.mxu3 %vm397_vm6, %v648_v8  ;;  %v691_v52 = vrot.slane %v631_v13, 4  ;;  %v1616_v13 = vperm.slane %v1046_v62, 3 }
 0x1ff   :  { %804 = vmatpush.msrb.mxu3 %v712_v17 }
 0x200   :  { %v574_v21 = vpop.permute.xlu1 %573 }
 0x201   :  { %805 = vmatpush.msrb.mxu3 %v708_v19  ;;  %v638_v27 = vpop.permute.xlu0 %637 }
 0x202   :  { %v641_v55 = vsel %vm318_vm8, %v638_v27, %v640_v3  ;;  %v642_v11 = vsel %vm318_vm8, %v636_v53, %v638_v27  ;;  %v560_v38 = vpop.permute.xlu2 %559  ;;  %v546_v27 = vsel %vm84_vm0, %v1405_v28, %v542_v40 }
 0x203   :  { %v647_v56 = vmul.f32 %v641_v55, %v328_v20  ;;  %v646_v12 = vmul.f32 %v642_v11, %v327_v35  ;;  %v577_v20 = vsel %vm162_vm3, %v574_v21, %v1446_v15  ;;  %v551_v51 = vmul.f32 %v546_v27, %v1615_v30 }
 0x204   :  { %v584_v8 = vmul.f32 %v577_v20, %v173_v9 }
 0x205   :  { %866 = vmatpush.msk.msrb.mxu2 %vm397_vm6, %v647_v56  ;;  %864 = vmatpush.msk.msrb.mxu1 %vm397_vm6, %v646_v12 }
 0x206   :  { %v668_v9 = vrot.slane %v584_v8, 4 }
 0x208   :  { %v606_v53 = vpop.permute.xlu1 %605 }
 0x209   :  { %v609_v59 = vsel %vm240_vm7, %v606_v53, %v608_v7  ;;  %v610_v63 = vsel %vm240_vm7, %v604_v45, %v606_v53  ;;  %v590_v4 = vpop.permute.xlu0 %589  ;;  %v578_v7 = vsel %vm162_vm3, %v1418_v6, %v574_v21  ;;  %v1612_v45 = vperm.slane %v1079_v10, 1 }
 0x20a   :  { %v614_v25 = vmul.f32 %v610_v63, %v249_v33  ;;  %v615_v35 = vmul.f32 %v609_v59, %v250_v24  ;;  %v593_v3 = vsel %vm201_vm4, %v590_v4, %v592_v49  ;;  %v594_v54 = vsel %vm201_vm4, %v588_v5, %v590_v4  ;;  %v538_v4 = vpop.permute.xlu2 %537 }
 0x20b   :  { %v598_v42 = vmul.f32 %v594_v54, %v1612_v45  ;;  %v599_v33 = vmul.f32 %v593_v3, %v211_v22  ;;  %v583_v31 = vmul.f32 %v578_v7, %v172_v16  ;;  %v579_v53 = vsel %vm162_vm3, %v1424_v61, %v1418_v6 }
 0x20c   :  { %v710_v18 = vsel %vm397_vm6, %v614_v25, %v690_v47  ;;  %v711_v24 = vsel %vm397_vm6, %v615_v35, %v691_v52  ;;  %v655_v63 = vrot.slane %v551_v51, 4  ;;  %v1617_v6 = vperm.slane %v1052_v0, 3 }
 0x20d   :  { %v678_v5 = vrot.slane %v598_v42, 4  ;;  %v679_v49 = vrot.slane %v599_v33, 4  ;;  %764 = vmatpush.msrb.mxu1 %v710_v18  ;;  %784 = vmatpush.msrb.mxu2 %v711_v24  ;;  %v667_v19 = vrot.slane %v583_v31, 4 }
 0x20f   :  { %v706_v10 = vsel %vm397_vm6, %v1336_v50, %v678_v5  ;;  %v707_v22 = vsel %vm397_vm6, %v1364_v46, %v679_v49 }
 0x210   :  { %765 = vmatpush.msrb.mxu1 %v706_v10  ;;  %785 = vmatpush.msrb.mxu2 %v707_v22  ;;  %v558_v60 = vpop.permute.xlu1 %557 }
 0x211   :  { %v561_v17 = vsel %vm123_vm5, %v558_v60, %v560_v38  ;;  %v562_v16 = vsel %vm123_vm5, %v1426_v29, %v558_v60  ;;  %v544_v21 = vpop.permute.xlu0 %543 }
 0x212   :  { %v567_v50 = vmul.f32 %v562_v16, %v1613_v43  ;;  %v568_v46 = vmul.f32 %v561_v17, %v1614_v44  ;;  %v545_v55 = vsel %vm84_vm0, %v542_v40, %v544_v21  ;;  %v580_v40 = vsel %vm162_vm3, %v1446_v15, %v1424_v61  ;;  %v520_v61 = vld [vmem:[%s1596_s2] sm:$0xf] }
 0x213   :  { %v552_v12 = vmul.f32 %v545_v55, %v1616_v13  ;;  %v582_v15 = vmul.f32 %v579_v53, %v171_v32  ;;  %v581_v7 = vmul.f32 %v580_v40, %v170_v39  ;;  %v548_v45 = vsel %vm84_vm0, %v544_v21, %v538_v4  ;;  %v815_v21 = vld.sshfl [vmem:[#allocation1] sm:$0xff pattern:$0x75316420] }
 0x214   :  { %v703_v11 = vsel %vm397_vm6, %v567_v50, %v667_v19  ;;  %v704_v56 = vsel %vm397_vm6, %v568_v46, %v668_v9  ;;  %v549_v2 = vmul.f32 %v548_v45, %v92_v41  ;;  %v816_v9 = vld.sshfl [vmem:[#allocation1 + $0x8] sm:$0xff pattern:$0x75316420] }
 0x215   :  { %786 = vmatpush.msrb.mxu2 %v703_v11  ;;  %806 = vmatpush.msrb.mxu3 %v704_v56  ;;  %v656_v25 = vrot.slane %v552_v12, 4  ;;  %v666_v18 = vrot.slane %v582_v15, 4  ;;  %v665_v24 = vrot.slane %v581_v7, 4 }
 0x216   :  { %v653_v8 = vrot.slane %v549_v2, 4 }
 0x218   :  { %v528_v47 = vpop.permute.xlu1 %527 }
 0x219   :  { %v526_v52 = vpop.permute.xlu0 %525 }
 0x21a   :  { %v529_v20 = vsel %vm46_vm1, %v526_v52, %v528_v47  ;;  %v530_v59 = vsel %vm46_vm1, %v1428_v48, %v526_v52 }
 0x21b   :  { %v535_v35 = vmul.f32 %v530_v59, %v55_v14  ;;  %v536_v3 = vmul.f32 %v529_v20, %v1617_v6  ;;  %v547_v14 = vsel %vm84_vm0, %v538_v4, %v1405_v28 }
 0x21c   :  { %v550_v42 = vmul.f32 %v547_v14, %v93_v26 }
 0x21d   :  { %v699_v54 = vsel %vm397_vm6, %v535_v35, %v655_v63  ;;  %v700_v34 = vsel %vm397_vm6, %v536_v3, %v656_v25 }
 0x21e   :  { %787 = vmatpush.msrb.mxu2 %v699_v54  ;;  %807 = vmatpush.msrb.mxu3 %v700_v34  ;;  %v654_v31 = vrot.slane %v550_v42, 4 }
 0x21f   :  { %869 = vmatmul.msk.f32.vlgmr.msrb.gmra.mxu3 %vm420_vm9, %v520_v61  ;;  %867 = vmatmul.msk.f32.vlgmr.msrb.gmra.mxu2 %vm420_vm9, %v520_v61 }
 0x220   :  { %v522_v32 = vpop.permute.xlu1 %521 }
 0x221   :  { %v531_v39 = vsel %vm46_vm1, %v522_v32, %v1428_v48  ;;  %v532_v28 = vsel %vm46_vm1, %v528_v47, %v522_v32  ;;  %v554_v33 = vpop.permute.xlu0 %553 }
 0x222   :  { %v563_v5 = vsel %vm123_vm5, %v554_v33, %v1426_v29  ;;  %v564_v26 = vsel %vm123_vm5, %v560_v38, %v554_v33  ;;  %v533_v62 = vmul.f32 %v532_v28, %v53_v37  ;;  %v534_v41 = vmul.f32 %v531_v39, %v54_v23  ;;  %v817_v23 = vld.sshfl [vmem:[#allocation1 + $0x10] sm:$0xff pattern:$0x75316420] }
 0x223   :  { %v565_v48 = vmul.f32 %v564_v26, %v131_v58  ;;  %v566_v49 = vmul.f32 %v563_v5, %v132_v57  ;;  %v818_v58 = vld.sshfl [vmem:[#allocation1 + $0x18] sm:$0xff pattern:$0x75316420] }
 0x224   :  { %v697_v36 = vsel %vm397_vm6, %v533_v62, %v653_v8  ;;  %v698_v37 = vsel %vm397_vm6, %v534_v41, %v654_v31 }
 0x225   :  { %v701_v10 = vsel %vm397_vm6, %v565_v48, %v665_v24  ;;  %v702_v29 = vsel %vm397_vm6, %v566_v49, %v666_v18 }
 0x226   :  { %746 = vmatpush.msrb.mxu0 %v701_v10  ;;  %766 = vmatpush.msrb.mxu1 %v702_v29 }
 0x228   :  { %747 = vmatpush.msrb.mxu0 %v697_v36  ;;  %767 = vmatpush.msrb.mxu1 %v698_v37 }
 0x229   :  { %863 = vmatmul.msk.f32.vlgmr.msrb.gmra.mxu0 %vm420_vm9, %v520_v61  ;;  %865 = vmatmul.msk.f32.vlgmr.msrb.gmra.mxu1 %vm420_vm9, %v520_v61 }
 0x256   :  { %v715_v0 = vpop.permute.xlu2 %714 }
 0x2a2   :  { %v809_v1 = vpop.f32.mrf.mxu3  ;;  %v789_v57 = vpop.f32.mrf.mxu2 }
 0x2a3   :  { %v810_v22 = vadd.f32 %v809_v1, %v715_v0  ;;  %v790_v38 = vadd.f32 %v789_v57, %v715_v0 }
 0x2a5   :  { %v826_v60 = vadd.f32 %v818_v58, %v810_v22  ;;  %v825_v17 = vadd.f32 %v817_v23, %v790_v38 }
 0x2a6   :  { %v749_v16 = vpop.f32.mrf.mxu0  ;;  %v769_v19 = vpop.f32.mrf.mxu1 }
 0x2a7   :  { %v830_v43 = vmax.f32 %v826_v60, 0.0  ;;  %v750_v50 = vadd.f32 %v749_v16, %v715_v0  ;;  %v770_v44 = vadd.f32 %v769_v19, %v715_v0  ;;  %v829_v46 = vmax.f32 %v825_v17, 0.0 }
 0x2a9   :  { %v836_v27 = vrot.slane %v830_v43, 4  ;;  %v823_v55 = vadd.f32 %v815_v21, %v750_v50  ;;  %v824_v11 = vadd.f32 %v816_v9, %v770_v44 }
 0x2ab   :  { %v828_v56 = vmax.f32 %v824_v11, 0.0  ;;  %v838_v30 = vsel %vm397_vm6, %v829_v46, %v836_v27  ;;  %v827_v51 = vmax.f32 %v823_v55, 0.0 }
 0x2ac   :  { %842 = vst [vmem:[%s1597_s5 + $0x8] sm:$0xff] %v838_v30 }
 0x2ad   :  { %v835_v13 = vrot.slane %v828_v56, 4 }
 0x2af   :  { %v837_v12 = vsel %vm397_vm6, %v827_v51, %v835_v13 }
 0x2b0   :  { %841 = vst [vmem:[%s1597_s5] sm:$0xff] %v837_v12 }

</bundles_post_ra>
